<compile_context>
chip_gen: v6e
topology: v6e:2x2x1
jax: 0.10.0
libtpu: 0.0.40
codegen_flags: <defaults>
</compile_context>

<pallas_src>
import functools

import numpy as np
import jax
import jax.numpy as jnp
from jax.experimental import pallas as pl
from jax.experimental.pallas import tpu as pltpu

HIDDEN = 16          # conv1 out channels
SPATIAL = 1024       # 32 * 32
EPS = 1e-5

MAX_ROW_TILE = 512   # 512 x 1024 f32 = 2 MiB per block


def _make_kernel(signs, compute_dtype):
    """Build the elementwise kernel with the per-channel max/min choice
    (sign of the folded conv2 weight) baked in at trace time."""
    cdt = jnp.dtype(compute_dtype)

    def kernel(params_ref, x_ref, o_ref):
        # params_ref: (33,) f32 SMEM = [p(16), q(16), t(1)]
        # x_ref / o_ref: (tile, lane) f32 VMEM
        x = x_ref[...]
        xc = x.astype(cdt)   # identity for f32; one cast for the bf16 path

        def chan(c):
            p = params_ref[c].astype(cdt)
            q = params_ref[HIDDEN + c].astype(cdt)
            z = p * xc + q
            # w2s_c * relu(a_c*x + d_c) == max(z,0) if w2s_c>=0 else min(z,0)
            return jnp.maximum(z, 0.0) if signs[c] else jnp.minimum(z, 0.0)

        # Two independent accumulators: breaks the serial add chain without
        # doubling live accumulator vregs (scalar splats are per grid step).
        acc0 = chan(0)
        acc1 = chan(1)
        for c in range(2, HIDDEN, 2):
            acc0 = acc0 + chan(c)
            acc1 = acc1 + chan(c + 1)

        y = (acc0 + acc1).astype(jnp.float32)
        o_ref[...] = (x + params_ref[2 * HIDDEN]) + y   # x + t + y, f32

    return kernel


def _choose_layout(total):
    """Pick a lane-dense (rows, lane) reshape and a row tile.

    lane is a multiple of 128 (wide unmasked stores).  The row tile is a
    multiple of 8 and at most MAX_ROW_TILE; the grid uses cdiv with a masked
    tail block so it never collapses to a single step when rows > 8 (keeps
    both v7x TensorCores busy).
    """
    lane = SPATIAL                      # 1024 = 8 vregs wide
    rows = total // lane
    while rows < 16 and lane > 256:     # small inputs: trade lane width for rows
        lane //= 2
        rows = total // lane
    if rows <= 8:
        return lane, rows, rows         # single full-extent block (always legal)
    tile = (rows // 8) // 8 * 8         # aim for ~8 grid steps
    tile = max(8, min(MAX_ROW_TILE, tile))
    return lane, rows, tile


@functools.partial(jax.jit, static_argnames=("signs", "compute_dtype"))
def _relation_cross_impl(x, a, d, w2s, t, signs, compute_dtype):
    # Fold conv2 into the per-channel affine (16-element ops, negligible).
    p = (w2s * a).astype(jnp.float32)
    q = (w2s * d).astype(jnp.float32)
    packed = jnp.concatenate([p, q, jnp.reshape(t, (1,)).astype(jnp.float32)])

    orig_shape = x.shape
    total = x.size
    lane, rows, tile = _choose_layout(total)

    # Row-major reshape: pure layout reinterpretation (op is elementwise),
    # NOT a transpose -- no extra HBM pass.
    xf = jnp.reshape(x, (rows, lane)).astype(jnp.float32)

    grid = (pl.cdiv(rows, tile),)

    # ~67 VALU ops / element; 1 read + 1 write of the array.
    cost = pl.CostEstimate(flops=67 * total, transcendentals=0,
                           bytes_accessed=8 * total + 4 * packed.size)

    out_flat = pl.pallas_call(
        _make_kernel(signs, compute_dtype),
        out_shape=jax.ShapeDtypeStruct((rows, lane), jnp.float32),
        grid_spec=pltpu.PrefetchScalarGridSpec(
            num_scalar_prefetch=0,
            grid=grid,
            in_specs=[
                pl.BlockSpec(memory_space=pltpu.MemorySpace.SMEM),  # packed (33,)
                pl.BlockSpec((tile, lane), lambda i: (i, 0)),
            ],
            out_specs=pl.BlockSpec((tile, lane), lambda i: (i, 0)),
        ),
        compiler_params=pltpu.CompilerParams(
            dimension_semantics=("parallel",)),
        cost_estimate=cost,
    )(packed, xf)

    return jnp.reshape(out_flat, orig_shape)


def relation_cross(x, params, compute_dtype="float32"):
    """x: (1024, N) float32, matching the PyTorch module's input. Returns (1024, N).

    compute_dtype="bfloat16" enables the packed-bf16 inner chain (v6e/v7x,
    ~1e-2 tolerance); default f32 is bit-accurate on all generations.
    """
    a, d, w2s, t = params
    assert x.shape[0] == SPATIAL
    # Signs of the folded conv2 weights are resolved on the host (concrete
    # 16-element array) so the max/min choice is static inside the kernel.
    signs = tuple(bool(s) for s in (np.asarray(w2s) >= 0.0))
    return _relation_cross_impl(x, a, d, w2s, t, signs, compute_dtype)


def make_params(key):
    """Deterministic parameter init mirroring the module's __init__ shapes.

    conv1.weight: (16, 1, 1, 1), BN(16);  conv2.weight: (1, 16, 1, 1), BN(1).
    BN params use PyTorch defaults (gamma=1, beta=0, mean=0, var=1), eval mode.
    """
    k1, k2 = jax.random.split(key)
    w1 = jax.random.normal(k1, (HIDDEN,), dtype=jnp.float32) * 0.1   # (16,1,1,1) squeezed
    w2 = jax.random.normal(k2, (HIDDEN,), dtype=jnp.float32) * 0.1   # (1,16,1,1) squeezed

    g1 = jnp.ones((HIDDEN,), jnp.float32)
    b1 = jnp.zeros((HIDDEN,), jnp.float32)
    m1 = jnp.zeros((HIDDEN,), jnp.float32)
    v1 = jnp.ones((HIDDEN,), jnp.float32)

    g2 = jnp.float32(1.0)
    b2 = jnp.float32(0.0)
    m2 = jnp.float32(0.0)
    v2 = jnp.float32(1.0)

    inv1 = g1 / jnp.sqrt(v1 + EPS)
    a = inv1 * w1                    # per-hidden-channel scale on x
    d = b1 - inv1 * m1               # per-hidden-channel shift
    s2 = g2 / jnp.sqrt(v2 + EPS)
    w2s = s2 * w2                    # folded conv2 weights
    t = jnp.reshape(b2 - s2 * m2, (1,))
    return a, d, w2s, t


def _reference(x, params):
    a, d, w2s, t = params
    h = jnp.maximum(x[..., None] * a + d, 0.0)       # (1024, N, 16)
    y = jnp.sum(h * w2s, axis=-1) + t[0]
    return x + y


if __name__ == "__main__":
    key = jax.random.PRNGKey(0)
    kx, kp = jax.random.split(key)
    params = make_params(kp)

    # N=64: even multi-step grid; N=20: masked tail block; N=3: the shape the
    # review flagged (rows=12 -> tile=8, grid=2, both v7x cores busy).
    for n in (64, 20, 3):
        x = jax.random.normal(jax.random.fold_in(kx, n), (SPATIAL, n),
                              dtype=jnp.float32)
        ref = _reference(x, params)
        out = jax.block_until_ready(relation_cross(x, params))
        assert out.shape == (SPATIAL, n)
        assert jnp.allclose(out, ref, atol=1e-5, rtol=1e-5), f"mismatch at N={n}"

    print("KERNEL_OK")
</pallas_src>

<mosaic_0001>
module attributes {stable_mosaic.version = 11 : i64} {
  func.func @kernel(%arg0: i32, %arg1: memref<33xf32, #tpu.memory_space<smem>>, %arg2: memref<8x1024xf32, #tpu.memory_space<vmem>>, %arg3: memref<8x1024xf32, #tpu.memory_space<vmem>>) attributes {dimension_semantics = [#tpu.dimension_semantics<parallel>], iteration_bounds = array<i64: 8>, scalar_prefetch = 0 : i64, scratch_operands = 0 : i64, tpu.core_type = #tpu.core_type<tc>, window_params = [{transform_indices = @transform_0, window_bounds = array<i64: 33>}, {transform_indices = @transform_1, window_bounds = array<i64: 8, 1024>}, {transform_indices = @transform_2, window_bounds = array<i64: 8, 1024>}]} {
    %c0 = arith.constant 0 : index
    %c0_0 = arith.constant 0 : index
    %0 = vector.load %arg2[%c0, %c0_0] : memref<8x1024xf32, #tpu.memory_space<vmem>>, vector<8x1024xf32>
    %c0_1 = arith.constant 0 : index
    %1 = memref.load %arg1[%c0_1] : memref<33xf32, #tpu.memory_space<smem>>
    %c16 = arith.constant 16 : index
    %2 = memref.load %arg1[%c16] : memref<33xf32, #tpu.memory_space<smem>>
    %3 = vector.broadcast %1 : f32 to vector<8x1024xf32>
    %4 = arith.mulf %3, %0 : vector<8x1024xf32>
    %5 = vector.broadcast %2 : f32 to vector<8x1024xf32>
    %6 = arith.addf %4, %5 : vector<8x1024xf32>
    %cst = arith.constant 0.000000e+00 : f32
    %7 = vector.broadcast %cst : f32 to vector<8x1024xf32>
    %8 = arith.minimumf %6, %7 : vector<8x1024xf32>
    %c1 = arith.constant 1 : index
    %9 = memref.load %arg1[%c1] : memref<33xf32, #tpu.memory_space<smem>>
    %c17 = arith.constant 17 : index
    %10 = memref.load %arg1[%c17] : memref<33xf32, #tpu.memory_space<smem>>
    %11 = vector.broadcast %9 : f32 to vector<8x1024xf32>
    %12 = arith.mulf %11, %0 : vector<8x1024xf32>
    %13 = vector.broadcast %10 : f32 to vector<8x1024xf32>
    %14 = arith.addf %12, %13 : vector<8x1024xf32>
    %cst_2 = arith.constant 0.000000e+00 : f32
    %15 = vector.broadcast %cst_2 : f32 to vector<8x1024xf32>
    %16 = arith.minimumf %14, %15 : vector<8x1024xf32>
    %c2 = arith.constant 2 : index
    %17 = memref.load %arg1[%c2] : memref<33xf32, #tpu.memory_space<smem>>
    %c18 = arith.constant 18 : index
    %18 = memref.load %arg1[%c18] : memref<33xf32, #tpu.memory_space<smem>>
    %19 = vector.broadcast %17 : f32 to vector<8x1024xf32>
    %20 = arith.mulf %19, %0 : vector<8x1024xf32>
    %21 = vector.broadcast %18 : f32 to vector<8x1024xf32>
    %22 = arith.addf %20, %21 : vector<8x1024xf32>
    %cst_3 = arith.constant 0.000000e+00 : f32
    %23 = vector.broadcast %cst_3 : f32 to vector<8x1024xf32>
    %24 = arith.maximumf %22, %23 : vector<8x1024xf32>
    %25 = arith.addf %8, %24 : vector<8x1024xf32>
    %c3 = arith.constant 3 : index
    %26 = memref.load %arg1[%c3] : memref<33xf32, #tpu.memory_space<smem>>
    %c19 = arith.constant 19 : index
    %27 = memref.load %arg1[%c19] : memref<33xf32, #tpu.memory_space<smem>>
    %28 = vector.broadcast %26 : f32 to vector<8x1024xf32>
    %29 = arith.mulf %28, %0 : vector<8x1024xf32>
    %30 = vector.broadcast %27 : f32 to vector<8x1024xf32>
    %31 = arith.addf %29, %30 : vector<8x1024xf32>
    %cst_4 = arith.constant 0.000000e+00 : f32
    %32 = vector.broadcast %cst_4 : f32 to vector<8x1024xf32>
    %33 = arith.minimumf %31, %32 : vector<8x1024xf32>
    %34 = arith.addf %16, %33 : vector<8x1024xf32>
    %c4 = arith.constant 4 : index
    %35 = memref.load %arg1[%c4] : memref<33xf32, #tpu.memory_space<smem>>
    %c20 = arith.constant 20 : index
    %36 = memref.load %arg1[%c20] : memref<33xf32, #tpu.memory_space<smem>>
    %37 = vector.broadcast %35 : f32 to vector<8x1024xf32>
    %38 = arith.mulf %37, %0 : vector<8x1024xf32>
    %39 = vector.broadcast %36 : f32 to vector<8x1024xf32>
    %40 = arith.addf %38, %39 : vector<8x1024xf32>
    %cst_5 = arith.constant 0.000000e+00 : f32
    %41 = vector.broadcast %cst_5 : f32 to vector<8x1024xf32>
    %42 = arith.minimumf %40, %41 : vector<8x1024xf32>
    %43 = arith.addf %25, %42 : vector<8x1024xf32>
    %c5 = arith.constant 5 : index
    %44 = memref.load %arg1[%c5] : memref<33xf32, #tpu.memory_space<smem>>
    %c21 = arith.constant 21 : index
    %45 = memref.load %arg1[%c21] : memref<33xf32, #tpu.memory_space<smem>>
    %46 = vector.broadcast %44 : f32 to vector<8x1024xf32>
    %47 = arith.mulf %46, %0 : vector<8x1024xf32>
    %48 = vector.broadcast %45 : f32 to vector<8x1024xf32>
    %49 = arith.addf %47, %48 : vector<8x1024xf32>
    %cst_6 = arith.constant 0.000000e+00 : f32
    %50 = vector.broadcast %cst_6 : f32 to vector<8x1024xf32>
    %51 = arith.minimumf %49, %50 : vector<8x1024xf32>
    %52 = arith.addf %34, %51 : vector<8x1024xf32>
    %c6 = arith.constant 6 : index
    %53 = memref.load %arg1[%c6] : memref<33xf32, #tpu.memory_space<smem>>
    %c22 = arith.constant 22 : index
    %54 = memref.load %arg1[%c22] : memref<33xf32, #tpu.memory_space<smem>>
    %55 = vector.broadcast %53 : f32 to vector<8x1024xf32>
    %56 = arith.mulf %55, %0 : vector<8x1024xf32>
    %57 = vector.broadcast %54 : f32 to vector<8x1024xf32>
    %58 = arith.addf %56, %57 : vector<8x1024xf32>
    %cst_7 = arith.constant 0.000000e+00 : f32
    %59 = vector.broadcast %cst_7 : f32 to vector<8x1024xf32>
    %60 = arith.maximumf %58, %59 : vector<8x1024xf32>
    %61 = arith.addf %43, %60 : vector<8x1024xf32>
    %c7 = arith.constant 7 : index
    %62 = memref.load %arg1[%c7] : memref<33xf32, #tpu.memory_space<smem>>
    %c23 = arith.constant 23 : index
    %63 = memref.load %arg1[%c23] : memref<33xf32, #tpu.memory_space<smem>>
    %64 = vector.broadcast %62 : f32 to vector<8x1024xf32>
    %65 = arith.mulf %64, %0 : vector<8x1024xf32>
    %66 = vector.broadcast %63 : f32 to vector<8x1024xf32>
    %67 = arith.addf %65, %66 : vector<8x1024xf32>
    %cst_8 = arith.constant 0.000000e+00 : f32
    %68 = vector.broadcast %cst_8 : f32 to vector<8x1024xf32>
    %69 = arith.maximumf %67, %68 : vector<8x1024xf32>
    %70 = arith.addf %52, %69 : vector<8x1024xf32>
    %c8 = arith.constant 8 : index
    %71 = memref.load %arg1[%c8] : memref<33xf32, #tpu.memory_space<smem>>
    %c24 = arith.constant 24 : index
    %72 = memref.load %arg1[%c24] : memref<33xf32, #tpu.memory_space<smem>>
    %73 = vector.broadcast %71 : f32 to vector<8x1024xf32>
    %74 = arith.mulf %73, %0 : vector<8x1024xf32>
    %75 = vector.broadcast %72 : f32 to vector<8x1024xf32>
    %76 = arith.addf %74, %75 : vector<8x1024xf32>
    %cst_9 = arith.constant 0.000000e+00 : f32
    %77 = vector.broadcast %cst_9 : f32 to vector<8x1024xf32>
    %78 = arith.minimumf %76, %77 : vector<8x1024xf32>
    %79 = arith.addf %61, %78 : vector<8x1024xf32>
    %c9 = arith.constant 9 : index
    %80 = memref.load %arg1[%c9] : memref<33xf32, #tpu.memory_space<smem>>
    %c25 = arith.constant 25 : index
    %81 = memref.load %arg1[%c25] : memref<33xf32, #tpu.memory_space<smem>>
    %82 = vector.broadcast %80 : f32 to vector<8x1024xf32>
    %83 = arith.mulf %82, %0 : vector<8x1024xf32>
    %84 = vector.broadcast %81 : f32 to vector<8x1024xf32>
    %85 = arith.addf %83, %84 : vector<8x1024xf32>
    %cst_10 = arith.constant 0.000000e+00 : f32
    %86 = vector.broadcast %cst_10 : f32 to vector<8x1024xf32>
    %87 = arith.minimumf %85, %86 : vector<8x1024xf32>
    %88 = arith.addf %70, %87 : vector<8x1024xf32>
    %c10 = arith.constant 10 : index
    %89 = memref.load %arg1[%c10] : memref<33xf32, #tpu.memory_space<smem>>
    %c26 = arith.constant 26 : index
    %90 = memref.load %arg1[%c26] : memref<33xf32, #tpu.memory_space<smem>>
    %91 = vector.broadcast %89 : f32 to vector<8x1024xf32>
    %92 = arith.mulf %91, %0 : vector<8x1024xf32>
    %93 = vector.broadcast %90 : f32 to vector<8x1024xf32>
    %94 = arith.addf %92, %93 : vector<8x1024xf32>
    %cst_11 = arith.constant 0.000000e+00 : f32
    %95 = vector.broadcast %cst_11 : f32 to vector<8x1024xf32>
    %96 = arith.maximumf %94, %95 : vector<8x1024xf32>
    %97 = arith.addf %79, %96 : vector<8x1024xf32>
    %c11 = arith.constant 11 : index
    %98 = memref.load %arg1[%c11] : memref<33xf32, #tpu.memory_space<smem>>
    %c27 = arith.constant 27 : index
    %99 = memref.load %arg1[%c27] : memref<33xf32, #tpu.memory_space<smem>>
    %100 = vector.broadcast %98 : f32 to vector<8x1024xf32>
    %101 = arith.mulf %100, %0 : vector<8x1024xf32>
    %102 = vector.broadcast %99 : f32 to vector<8x1024xf32>
    %103 = arith.addf %101, %102 : vector<8x1024xf32>
    %cst_12 = arith.constant 0.000000e+00 : f32
    %104 = vector.broadcast %cst_12 : f32 to vector<8x1024xf32>
    %105 = arith.maximumf %103, %104 : vector<8x1024xf32>
    %106 = arith.addf %88, %105 : vector<8x1024xf32>
    %c12 = arith.constant 12 : index
    %107 = memref.load %arg1[%c12] : memref<33xf32, #tpu.memory_space<smem>>
    %c28 = arith.constant 28 : index
    %108 = memref.load %arg1[%c28] : memref<33xf32, #tpu.memory_space<smem>>
    %109 = vector.broadcast %107 : f32 to vector<8x1024xf32>
    %110 = arith.mulf %109, %0 : vector<8x1024xf32>
    %111 = vector.broadcast %108 : f32 to vector<8x1024xf32>
    %112 = arith.addf %110, %111 : vector<8x1024xf32>
    %cst_13 = arith.constant 0.000000e+00 : f32
    %113 = vector.broadcast %cst_13 : f32 to vector<8x1024xf32>
    %114 = arith.maximumf %112, %113 : vector<8x1024xf32>
    %115 = arith.addf %97, %114 : vector<8x1024xf32>
    %c13 = arith.constant 13 : index
    %116 = memref.load %arg1[%c13] : memref<33xf32, #tpu.memory_space<smem>>
    %c29 = arith.constant 29 : index
    %117 = memref.load %arg1[%c29] : memref<33xf32, #tpu.memory_space<smem>>
    %118 = vector.broadcast %116 : f32 to vector<8x1024xf32>
    %119 = arith.mulf %118, %0 : vector<8x1024xf32>
    %120 = vector.broadcast %117 : f32 to vector<8x1024xf32>
    %121 = arith.addf %119, %120 : vector<8x1024xf32>
    %cst_14 = arith.constant 0.000000e+00 : f32
    %122 = vector.broadcast %cst_14 : f32 to vector<8x1024xf32>
    %123 = arith.maximumf %121, %122 : vector<8x1024xf32>
    %124 = arith.addf %106, %123 : vector<8x1024xf32>
    %c14 = arith.constant 14 : index
    %125 = memref.load %arg1[%c14] : memref<33xf32, #tpu.memory_space<smem>>
    %c30 = arith.constant 30 : index
    %126 = memref.load %arg1[%c30] : memref<33xf32, #tpu.memory_space<smem>>
    %127 = vector.broadcast %125 : f32 to vector<8x1024xf32>
    %128 = arith.mulf %127, %0 : vector<8x1024xf32>
    %129 = vector.broadcast %126 : f32 to vector<8x1024xf32>
    %130 = arith.addf %128, %129 : vector<8x1024xf32>
    %cst_15 = arith.constant 0.000000e+00 : f32
    %131 = vector.broadcast %cst_15 : f32 to vector<8x1024xf32>
    %132 = arith.minimumf %130, %131 : vector<8x1024xf32>
    %133 = arith.addf %115, %132 : vector<8x1024xf32>
    %c15 = arith.constant 15 : index
    %134 = memref.load %arg1[%c15] : memref<33xf32, #tpu.memory_space<smem>>
    %c31 = arith.constant 31 : index
    %135 = memref.load %arg1[%c31] : memref<33xf32, #tpu.memory_space<smem>>
    %136 = vector.broadcast %134 : f32 to vector<8x1024xf32>
    %137 = arith.mulf %136, %0 : vector<8x1024xf32>
    %138 = vector.broadcast %135 : f32 to vector<8x1024xf32>
    %139 = arith.addf %137, %138 : vector<8x1024xf32>
    %cst_16 = arith.constant 0.000000e+00 : f32
    %140 = vector.broadcast %cst_16 : f32 to vector<8x1024xf32>
    %141 = arith.maximumf %139, %140 : vector<8x1024xf32>
    %142 = arith.addf %124, %141 : vector<8x1024xf32>
    %143 = arith.addf %133, %142 : vector<8x1024xf32>
    %c32 = arith.constant 32 : index
    %144 = memref.load %arg1[%c32] : memref<33xf32, #tpu.memory_space<smem>>
    %145 = vector.broadcast %144 : f32 to vector<8x1024xf32>
    %146 = arith.addf %0, %145 : vector<8x1024xf32>
    %147 = arith.addf %146, %143 : vector<8x1024xf32>
    %c0_17 = arith.constant 0 : index
    %c0_18 = arith.constant 0 : index
    %148 = vector.load %arg3[%c0_17, %c0_18] : memref<8x1024xf32, #tpu.memory_space<vmem>>, vector<8x1024xf32>
    tpu.vector_store %arg3[%c0_17, %c0_18], %147 {strides = array<i32>} : memref<8x1024xf32, #tpu.memory_space<vmem>>, vector<8x1024xf32>,
    return
  }
  func.func @transform_0(%arg0: i32) -> i32 {
    %c0_i32 = arith.constant 0 : i32
    %c0_i32_0 = arith.constant 0 : i32
    return %c0_i32 : i32
  }
  func.func @transform_1(%arg0: i32) -> (i32, i32) {
    %c0_i32 = arith.constant 0 : i32
    %c0_i32_0 = arith.constant 0 : i32
    return %arg0, %c0_i32 : i32, i32
  }
  func.func @transform_2(%arg0: i32) -> (i32, i32) {
    %c0_i32 = arith.constant 0 : i32
    %c0_i32_0 = arith.constant 0 : i32
    return %arg0, %c0_i32 : i32, i32
  }
}

</mosaic_0001>

<bundles_post_ra>
// kernel: _relation_cross_impl.1
= control target key start
LH: loop header
LB: loop body
LE: loop exit
PB: predicated region body
PF: predicated region fallthrough
CT: control target
= control target key end

     0   :  { %7 = vsyncpa [#allocation3], 0  ;;  %s944_s9 = smov 0   ;;  %s1594_s0 = inlined_call_operand.vmem [shape: f32[33], index: 0, kind: input, shape index: {}]   ;;  %s1595_s1 = inlined_call_operand.vmem [shape: f32[64,1024], index: 1, kind: input, shape index: {}]   ;;  %s1596_s2 = inlined_call_operand.vmem [shape: f32[64,1024], index: 2, kind: output, shape index: {}]  }
   0x1 LB: > { %s827_s10 = sadd.s32 4294967295, %s926_s9   ;;  %p829_p0 = scmp.ge.s32.totalorder %s926_s9, 1  ;;  %s926_s9 = sphi %s944_s9, %s13_s9  }
   0x2   : > { %p91_p1 = scmp.lt.s32.totalorder %s926_s9, 9  ;;  %s104_s13 = sshll.u32 %s1594_s0, 4  ;;  %s105_s13 = int_to_ptr.vmem [resolvable:$true] %s104_s13 }
   0x3   : > { %p882_p3 = scmp.eq.s32.totalorder %s827_s10, 0  ;;  %s901_s15 = scalar_lea.vmem %s105_s13, 16 }
   0x4   : > { %p955_p2 = pnand %p829_p0, %p91_p1  ;;  %p902_p6 = scmp.ne.s32.totalorder %s105_s13, %s901_s15 }
   0x5   : > { %p909_p10 = scmp.lt.s32.totalorder %s105_s13, %s105_s13  ;;  %p910_p11 = scmp.lt.s32.totalorder %s901_s15, %s901_s15 }
   0x6   : > { %p878_p4 = pneg %p955_p2 }
   0x7   : > { %p911_p12 = por %p910_p11, %p909_p10 }
   0x8   : > { %p879_p5 = pnand %p882_p3, %p878_p4 }
   0xa   : > { %p903_p7 = pneg %p879_p5 }
   0xc   : > { %p904_p8 = pnand %p903_p7, %p902_p6 }
   0xe   : > { %p905_p9 = pneg %p904_p8 }
  0x10   : > { %p912_p13 = pnand %p911_p12, %p905_p9 }
  0x12   : > { %915 = shalt.err (!%p912_p13)
}
  0x13   : > { %s928_s16 = smov [#allocation2]   ;;  %125 = sbr.rel (%p955_p2) target bundleno = 176 (0xb0), region = 28 }
  0x14   : > { %881 = dma.vmem_to_smem (!%p879_p5), %s105_s13, 16, %s928_s16, [#allocation3]  }
  0x18   : > { %921 = dma.done.wait (%p882_p3), [#allocation3], 16  }
  0x19   : > { %923 = vsyncadd (%p882_p3), [#allocation3], 4294967280 }
  0x1a   : > { %131 = sfence }
  0x1b   : > { %p148_p0 = scmp.lt.s32.totalorder %s827_s10, 7  ;;  %s166_s17 = sld [smem:[#allocation2]] }
  0x1c   : > { %s838_s18 = sld [smem:[#allocation2 + $0x10]] }
  0x1d   : > { %s1603_s10 = smov (!%p148_p0, %s827_s10), 7  ;;  %s969_s20 = sld [smem:[#allocation2 + $0x1]] }
  0x1e   : > { %s872_s19 = sshll.u32 %s1603_s10, 6  ;;  %s978_s24 = sld [smem:[#allocation2 + $0x11]] }
  0x1f   : > { %s976_s23 = scalar_lea.vmem %s1595_s1, %s872_s19  ;;  %s1016_s25 = sld [smem:[#allocation2 + $0x2]] }
  0x20   : > { %v981_v0 = vld [vmem:[%s976_s23] sm:$0xff]  ;;  %v984_v1 = vld [vmem:[%s976_s23 + $0x8] sm:$0xff]  ;;  %v987_v2 = vld [vmem:[%s976_s23 + $0x10] sm:$0xff]  ;;  %s1026_s26 = sld [smem:[#allocation2 + $0x12]] }
  0x21   : > { %v168_v3 = vstv %s166_s17  ;;  %v990_v4 = vld [vmem:[%s976_s23 + $0x18] sm:$0xff]  ;;  %v993_v5 = vld [vmem:[%s976_s23 + $0x20] sm:$0xff]  ;;  %v996_v6 = vld [vmem:[%s976_s23 + $0x28] sm:$0xff]  ;;  %s1034_s27 = sld [smem:[#allocation2 + $0x3]] }
  0x22   : > { %v169_v7 = vmul.f32 %v168_v3, %v981_v0  ;;  %v170_v8 = vmul.f32 %v168_v3, %v984_v1  ;;  %v171_v9 = vmul.f32 %v168_v3, %v987_v2  ;;  %v177_v10 = vstv %s838_s18  ;;  %v1002_v11 = vld [vmem:[%s976_s23 + $0x30] sm:$0xff]  ;;  %v1005_v12 = vld [vmem:[%s976_s23 + $0x38] sm:$0xff]  ;;  %s1040_s28 = sld [smem:[#allocation2 + $0x13]] }
  0x23   : > { %v172_v13 = vmul.f32 %v168_v3, %v990_v4  ;;  %v173_v14 = vmul.f32 %v168_v3, %v993_v5  ;;  %v174_v15 = vmul.f32 %v168_v3, %v996_v6  ;;  %v175_v16 = vmul.f32 %v168_v3, %v1002_v11  ;;  %s1090_s29 = sld [smem:[#allocation2 + $0x4]] }
  0x24   : > { %v176_v17 = vmul.f32 %v168_v3, %v1005_v12  ;;  %v1012_v18 = vadd.f32 %v177_v10, %v169_v7  ;;  %v1014_v19 = vadd.f32 %v177_v10, %v170_v8  ;;  %v1018_v20 = vadd.f32 %v177_v10, %v171_v9  ;;  %s1108_s30 = sld [smem:[#allocation2 + $0x14]] }
  0x25   : > { %v1020_v21 = vadd.f32 %v177_v10, %v172_v13  ;;  %v1022_v22 = vadd.f32 %v177_v10, %v173_v14  ;;  %v1024_v23 = vadd.f32 %v177_v10, %v174_v15  ;;  %v1028_v24 = vadd.f32 %v177_v10, %v175_v16  ;;  %s1126_s3 = sld [smem:[#allocation2 + $0x5]] }
  0x26   : > { %v1030_v25 = vadd.f32 %v177_v10, %v176_v17  ;;  %v186_v26 = vmin.f32 %v1012_v18, 0.0  ;;  %v187_v27 = vmin.f32 %v1014_v19, 0.0  ;;  %v188_v28 = vmin.f32 %v1018_v20, 0.0  ;;  %s1132_s4 = sld [smem:[#allocation2 + $0x15]] }
  0x27   : > { %v189_v29 = vmin.f32 %v1020_v21, 0.0  ;;  %v190_v30 = vmin.f32 %v1022_v22, 0.0  ;;  %v191_v31 = vmin.f32 %v1024_v23, 0.0  ;;  %v192_v32 = vmin.f32 %v1028_v24, 0.0  ;;  %s1182_s5 = sld [smem:[#allocation2 + $0x6]] }
  0x28   : > { %v193_v33 = vmin.f32 %v1030_v25, 0.0  ;;  %v196_v34 = vstv %s969_s20  ;;  %v205_v35 = vstv %s978_s24  ;;  %v224_v60 = vstv %s1016_s25  ;;  %s1196_s6 = sld [smem:[#allocation2 + $0x16]] }
  0x29   : > { %v197_v36 = vmul.f32 %v196_v34, %v981_v0  ;;  %v198_v37 = vmul.f32 %v196_v34, %v984_v1  ;;  %v199_v38 = vmul.f32 %v196_v34, %v987_v2  ;;  %v200_v39 = vmul.f32 %v196_v34, %v990_v4  ;;  %s1210_s7 = sld [smem:[#allocation2 + $0x7]] }
  0x2a   : > { %v201_v40 = vmul.f32 %v196_v34, %v993_v5  ;;  %v202_v41 = vmul.f32 %v196_v34, %v996_v6  ;;  %v203_v42 = vmul.f32 %v196_v34, %v1002_v11  ;;  %v204_v43 = vmul.f32 %v196_v34, %v1005_v12  ;;  %s1216_s8 = sld [smem:[#allocation2 + $0x17]] }
  0x2b   : > { %v1054_v44 = vadd.f32 %v205_v35, %v197_v36  ;;  %v1056_v45 = vadd.f32 %v205_v35, %v198_v37  ;;  %v1058_v46 = vadd.f32 %v205_v35, %v199_v38  ;;  %v1060_v47 = vadd.f32 %v205_v35, %v200_v39  ;;  %s1258_s11 = sld [smem:[#allocation2 + $0x8]] }
  0x2c   : > { %v1062_v48 = vadd.f32 %v205_v35, %v201_v40  ;;  %v1064_v49 = vadd.f32 %v205_v35, %v202_v41  ;;  %v1066_v50 = vadd.f32 %v205_v35, %v203_v42  ;;  %v1068_v51 = vadd.f32 %v205_v35, %v204_v43  ;;  %s1272_s12 = sld [smem:[#allocation2 + $0x18]] }
  0x2d   : > { %v214_v52 = vmin.f32 %v1054_v44, 0.0  ;;  %v215_v53 = vmin.f32 %v1056_v45, 0.0  ;;  %v216_v54 = vmin.f32 %v1058_v46, 0.0  ;;  %v217_v55 = vmin.f32 %v1060_v47, 0.0  ;;  %s1286_s13 = sld [smem:[#allocation2 + $0x9]] }
  0x2e   : > { %v233_v61 = vstv %s1026_s26  ;;  %v260_v62 = vstv %s1034_s27  ;;  %v269_v63 = vstv %s1040_s28  ;;  %v225_v3 = vmul.f32 %v224_v60, %v981_v0  ;;  %s1292_s14 = sld [smem:[#allocation2 + $0x19]] }
  0x2f   : > { %v226_v7 = vmul.f32 %v224_v60, %v984_v1  ;;  %v227_v8 = vmul.f32 %v224_v60, %v987_v2  ;;  %v228_v9 = vmul.f32 %v224_v60, %v990_v4  ;;  %v229_v10 = vmul.f32 %v224_v60, %v993_v5  ;;  %s1334_s15 = sld [smem:[#allocation2 + $0xa]] }
  0x30   : > { %v230_v13 = vmul.f32 %v224_v60, %v996_v6  ;;  %v231_v14 = vmul.f32 %v224_v60, %v1002_v11  ;;  %v232_v15 = vmul.f32 %v224_v60, %v1005_v12  ;;  %v234_v16 = vadd.f32 %v233_v61, %v225_v3  ;;  %s1348_s16 = sld [smem:[#allocation2 + $0x1a]] }
  0x31   : > { %v235_v17 = vadd.f32 %v233_v61, %v226_v7  ;;  %v236_v34 = vadd.f32 %v233_v61, %v227_v8  ;;  %v237_v35 = vadd.f32 %v233_v61, %v228_v9  ;;  %v238_v36 = vadd.f32 %v233_v61, %v229_v10  ;;  %s1362_s17 = sld [smem:[#allocation2 + $0xb]] }
  0x32   : > { %v239_v37 = vadd.f32 %v233_v61, %v230_v13  ;;  %v240_v38 = vadd.f32 %v233_v61, %v231_v14  ;;  %v241_v39 = vadd.f32 %v233_v61, %v232_v15  ;;  %v242_v40 = vmax.f32 %v234_v16, 0.0  ;;  %s1368_s18 = sld [smem:[#allocation2 + $0x1b]] }
  0x33   : > { %v243_v41 = vmax.f32 %v235_v17, 0.0  ;;  %v244_v42 = vmax.f32 %v236_v34, 0.0  ;;  %v245_v43 = vmax.f32 %v237_v35, 0.0  ;;  %v246_v59 = vmax.f32 %v238_v36, 0.0  ;;  %s1410_s20 = sld [smem:[#allocation2 + $0xc]] }
  0x34   : > { %v247_v58 = vmax.f32 %v239_v37, 0.0  ;;  %v248_v57 = vmax.f32 %v240_v38, 0.0  ;;  %v249_v56 = vmax.f32 %v241_v39, 0.0  ;;  %v1094_v60 = vadd.f32 %v242_v40, %v186_v26  ;;  %s1424_s21 = sld [smem:[#allocation2 + $0x1c]] }
  0x35   : > { %v1098_v3 = vadd.f32 %v243_v41, %v187_v27  ;;  %v1102_v61 = vadd.f32 %v244_v42, %v188_v28  ;;  %v1106_v7 = vadd.f32 %v245_v43, %v189_v29  ;;  %v1112_v8 = vadd.f32 %v246_v59, %v190_v30  ;;  %s1438_s22 = sld [smem:[#allocation2 + $0xd]] }
  0x36   : > { %v1116_v18 = vadd.f32 %v247_v58, %v191_v31  ;;  %v1120_v19 = vadd.f32 %v248_v57, %v192_v32  ;;  %v1124_v20 = vadd.f32 %v249_v56, %v193_v33  ;;  %v261_v21 = vmul.f32 %v260_v62, %v981_v0  ;;  %s1444_s24 = sld [smem:[#allocation2 + $0x1d]] }
  0x37   : > { %v262_v22 = vmul.f32 %v260_v62, %v984_v1  ;;  %v263_v26 = vmul.f32 %v260_v62, %v987_v2  ;;  %v264_v23 = vmul.f32 %v260_v62, %v990_v4  ;;  %v265_v24 = vmul.f32 %v260_v62, %v993_v5  ;;  %s1486_s25 = sld [smem:[#allocation2 + $0xe]] }
  0x38   : > { %v266_v27 = vmul.f32 %v260_v62, %v996_v6  ;;  %v267_v25 = vmul.f32 %v260_v62, %v1002_v11  ;;  %v268_v28 = vmul.f32 %v260_v62, %v1005_v12  ;;  %v270_v29 = vadd.f32 %v269_v63, %v261_v21  ;;  %s1500_s26 = sld [smem:[#allocation2 + $0x1e]] }
  0x39   : > { %v271_v30 = vadd.f32 %v269_v63, %v262_v22  ;;  %v272_v31 = vadd.f32 %v269_v63, %v263_v26  ;;  %v273_v32 = vadd.f32 %v269_v63, %v264_v23  ;;  %v274_v33 = vadd.f32 %v269_v63, %v265_v24  ;;  %s1514_s27 = sld [smem:[#allocation2 + $0xf]] }
  0x3a   : > { %v275_v56 = vadd.f32 %v269_v63, %v266_v27  ;;  %v276_v57 = vadd.f32 %v269_v63, %v267_v25  ;;  %v277_v58 = vadd.f32 %v269_v63, %v268_v28  ;;  %v278_v59 = vmin.f32 %v270_v29, 0.0  ;;  %s1520_s28 = sld [smem:[#allocation2 + $0x1f]] }
  0x3b   : > { %v279_v9 = vmin.f32 %v271_v30, 0.0  ;;  %v280_v10 = vmin.f32 %v272_v31, 0.0  ;;  %v281_v13 = vmin.f32 %v273_v32, 0.0  ;;  %v282_v14 = vmin.f32 %v274_v33, 0.0 }
  0x3c   : > { %v283_v15 = vmin.f32 %v275_v56, 0.0  ;;  %v284_v16 = vmin.f32 %v276_v57, 0.0  ;;  %v285_v62 = vmin.f32 %v277_v58, 0.0  ;;  %v1140_v17 = vadd.f32 %v278_v59, %v214_v52 }
  0x3d   : > { %v1144_v34 = vadd.f32 %v279_v9, %v215_v53  ;;  %v1148_v63 = vadd.f32 %v280_v10, %v216_v54  ;;  %v1152_v35 = vadd.f32 %v281_v13, %v217_v55  ;;  %v1598_v36 = vmin.f32 %v1062_v48, 0.0 }
  0x3e   : > { %v1599_v44 = vmin.f32 %v1064_v49, 0.0  ;;  %v1600_v45 = vmin.f32 %v1066_v50, 0.0  ;;  %v1601_v46 = vmin.f32 %v1068_v51, 0.0  ;;  %v296_v38 = vstv %s1090_s29  ;;  %s869_s29 = sld [smem:[#allocation2 + $0x20]] }
  0x3f   : > { %v1156_v37 = vadd.f32 %v282_v14, %v1598_v36  ;;  %v305_v47 = vstv %s1108_s30  ;;  %v332_v55 = vstv %s1126_s3  ;;  %v341_v39 = vstv %s1132_s4  ;;  %s157_s3 = scalar_lea.vmem %s1596_s2, %s872_s19 }
  0x40   : > { %v1160_v52 = vadd.f32 %v283_v15, %v1599_v44  ;;  %v1164_v53 = vadd.f32 %v284_v16, %v1600_v45  ;;  %v1168_v54 = vadd.f32 %v285_v62, %v1601_v46  ;;  %v297_v48 = vmul.f32 %v296_v38, %v981_v0 }
  0x41   : > { %v298_v40 = vmul.f32 %v296_v38, %v984_v1  ;;  %v299_v49 = vmul.f32 %v296_v38, %v987_v2  ;;  %v300_v41 = vmul.f32 %v296_v38, %v990_v4  ;;  %v301_v50 = vmul.f32 %v296_v38, %v993_v5 }
  0x42   : > { %v302_v42 = vmul.f32 %v296_v38, %v996_v6  ;;  %v303_v51 = vmul.f32 %v296_v38, %v1002_v11  ;;  %v304_v43 = vmul.f32 %v296_v38, %v1005_v12  ;;  %v306_v21 = vadd.f32 %v305_v47, %v297_v48 }
  0x43   : > { %v307_v22 = vadd.f32 %v305_v47, %v298_v40  ;;  %v308_v26 = vadd.f32 %v305_v47, %v299_v49  ;;  %v309_v23 = vadd.f32 %v305_v47, %v300_v41  ;;  %v310_v24 = vadd.f32 %v305_v47, %v301_v50 }
  0x44   : > { %v311_v27 = vadd.f32 %v305_v47, %v302_v42  ;;  %v312_v25 = vadd.f32 %v305_v47, %v303_v51  ;;  %v313_v28 = vadd.f32 %v305_v47, %v304_v43  ;;  %v314_v29 = vmin.f32 %v306_v21, 0.0 }
  0x45   : > { %v315_v30 = vmin.f32 %v307_v22, 0.0  ;;  %v316_v31 = vmin.f32 %v308_v26, 0.0  ;;  %v317_v32 = vmin.f32 %v309_v23, 0.0  ;;  %v318_v33 = vmin.f32 %v310_v24, 0.0 }
  0x46   : > { %v319_v56 = vmin.f32 %v311_v27, 0.0  ;;  %v320_v57 = vmin.f32 %v312_v25, 0.0  ;;  %v321_v58 = vmin.f32 %v313_v28, 0.0  ;;  %v1185_v59 = vadd.f32 %v314_v29, %v1094_v60 }
  0x47   : > { %v1188_v9 = vadd.f32 %v315_v30, %v1098_v3  ;;  %v1191_v10 = vadd.f32 %v316_v31, %v1102_v61  ;;  %v1194_v13 = vadd.f32 %v317_v32, %v1106_v7  ;;  %v1199_v14 = vadd.f32 %v318_v33, %v1112_v8 }
  0x48   : > { %v1202_v15 = vadd.f32 %v319_v56, %v1116_v18  ;;  %v1205_v60 = vadd.f32 %v320_v57, %v1120_v19  ;;  %v1208_v3 = vadd.f32 %v321_v58, %v1124_v20  ;;  %v333_v61 = vmul.f32 %v332_v55, %v981_v0 }
  0x49   : > { %v334_v7 = vmul.f32 %v332_v55, %v984_v1  ;;  %v335_v16 = vmul.f32 %v332_v55, %v987_v2  ;;  %v336_v8 = vmul.f32 %v332_v55, %v990_v4  ;;  %v337_v18 = vmul.f32 %v332_v55, %v993_v5 }
  0x4a   : > { %v338_v19 = vmul.f32 %v332_v55, %v996_v6  ;;  %v339_v62 = vmul.f32 %v332_v55, %v1002_v11  ;;  %v340_v20 = vmul.f32 %v332_v55, %v1005_v12  ;;  %v342_v36 = vadd.f32 %v341_v39, %v333_v61 }
  0x4b   : > { %v343_v44 = vadd.f32 %v341_v39, %v334_v7  ;;  %v344_v45 = vadd.f32 %v341_v39, %v335_v16  ;;  %v345_v46 = vadd.f32 %v341_v39, %v336_v8  ;;  %v346_v38 = vadd.f32 %v341_v39, %v337_v18 }
  0x4c   : > { %v347_v47 = vadd.f32 %v341_v39, %v338_v19  ;;  %v348_v48 = vadd.f32 %v341_v39, %v339_v62  ;;  %v349_v40 = vadd.f32 %v341_v39, %v340_v20  ;;  %v350_v49 = vmin.f32 %v342_v36, 0.0 }
  0x4d   : > { %v351_v41 = vmin.f32 %v343_v44, 0.0  ;;  %v352_v50 = vmin.f32 %v344_v45, 0.0  ;;  %v353_v42 = vmin.f32 %v345_v46, 0.0  ;;  %v354_v51 = vmin.f32 %v346_v38, 0.0 }
  0x4e   : > { %v355_v43 = vmin.f32 %v347_v47, 0.0  ;;  %v356_v21 = vmin.f32 %v348_v48, 0.0  ;;  %v357_v55 = vmin.f32 %v349_v40, 0.0  ;;  %v1223_v22 = vadd.f32 %v350_v49, %v1140_v17 }
  0x4f   : > { %v1226_v26 = vadd.f32 %v351_v41, %v1144_v34  ;;  %v1229_v39 = vadd.f32 %v352_v50, %v1148_v63  ;;  %v1232_v23 = vadd.f32 %v353_v42, %v1152_v35  ;;  %v1235_v24 = vadd.f32 %v354_v51, %v1156_v37 }
  0x50   : > { %v1238_v27 = vadd.f32 %v355_v43, %v1160_v52  ;;  %v1241_v25 = vadd.f32 %v356_v21, %v1164_v53  ;;  %v1244_v17 = vadd.f32 %v357_v55, %v1168_v54  ;;  %v368_v34 = vstv %s1182_s5 }
  0x51   : > { %v377_v28 = vstv %s1196_s6  ;;  %v404_v29 = vstv %s1210_s7  ;;  %v413_v63 = vstv %s1216_s8  ;;  %v369_v30 = vmul.f32 %v368_v34, %v981_v0 }
  0x52   : > { %v370_v35 = vmul.f32 %v368_v34, %v984_v1  ;;  %v371_v37 = vmul.f32 %v368_v34, %v987_v2  ;;  %v372_v31 = vmul.f32 %v368_v34, %v990_v4  ;;  %v373_v52 = vmul.f32 %v368_v34, %v993_v5 }
  0x53   : > { %v374_v53 = vmul.f32 %v368_v34, %v996_v6  ;;  %v375_v32 = vmul.f32 %v368_v34, %v1002_v11  ;;  %v376_v54 = vmul.f32 %v368_v34, %v1005_v12  ;;  %v378_v33 = vadd.f32 %v377_v28, %v369_v30 }
  0x54   : > { %v379_v56 = vadd.f32 %v377_v28, %v370_v35  ;;  %v380_v57 = vadd.f32 %v377_v28, %v371_v37  ;;  %v381_v58 = vadd.f32 %v377_v28, %v372_v31  ;;  %v382_v61 = vadd.f32 %v377_v28, %v373_v52 }
  0x55   : > { %v383_v7 = vadd.f32 %v377_v28, %v374_v53  ;;  %v384_v16 = vadd.f32 %v377_v28, %v375_v32  ;;  %v385_v8 = vadd.f32 %v377_v28, %v376_v54  ;;  %v386_v18 = vmax.f32 %v378_v33, 0.0 }
  0x56   : > { %v387_v19 = vmax.f32 %v379_v56, 0.0  ;;  %v388_v62 = vmax.f32 %v380_v57, 0.0  ;;  %v389_v20 = vmax.f32 %v381_v58, 0.0  ;;  %v390_v36 = vmax.f32 %v382_v61, 0.0 }
  0x57   : > { %v391_v44 = vmax.f32 %v383_v7, 0.0  ;;  %v392_v45 = vmax.f32 %v384_v16, 0.0  ;;  %v393_v46 = vmax.f32 %v385_v8, 0.0  ;;  %v1261_v38 = vadd.f32 %v386_v18, %v1185_v59 }
  0x58   : > { %v1264_v47 = vadd.f32 %v387_v19, %v1188_v9  ;;  %v1267_v48 = vadd.f32 %v388_v62, %v1191_v10  ;;  %v1270_v40 = vadd.f32 %v389_v20, %v1194_v13  ;;  %v1275_v49 = vadd.f32 %v390_v36, %v1199_v14 }
  0x59   : > { %v1278_v41 = vadd.f32 %v391_v44, %v1202_v15  ;;  %v1281_v59 = vadd.f32 %v392_v45, %v1205_v60  ;;  %v1284_v9 = vadd.f32 %v393_v46, %v1208_v3  ;;  %v405_v10 = vmul.f32 %v404_v29, %v981_v0 }
  0x5a   : > { %v406_v13 = vmul.f32 %v404_v29, %v984_v1  ;;  %v407_v50 = vmul.f32 %v404_v29, %v987_v2  ;;  %v408_v14 = vmul.f32 %v404_v29, %v990_v4  ;;  %v409_v15 = vmul.f32 %v404_v29, %v993_v5 }
  0x5b   : > { %v410_v60 = vmul.f32 %v404_v29, %v996_v6  ;;  %v411_v42 = vmul.f32 %v404_v29, %v1002_v11  ;;  %v412_v3 = vmul.f32 %v404_v29, %v1005_v12  ;;  %v414_v51 = vadd.f32 %v413_v63, %v405_v10 }
  0x5c   : > { %v415_v43 = vadd.f32 %v413_v63, %v406_v13  ;;  %v416_v21 = vadd.f32 %v413_v63, %v407_v50  ;;  %v417_v55 = vadd.f32 %v413_v63, %v408_v14  ;;  %v418_v34 = vadd.f32 %v413_v63, %v409_v15 }
  0x5d   : > { %v419_v28 = vadd.f32 %v413_v63, %v410_v60  ;;  %v420_v30 = vadd.f32 %v413_v63, %v411_v42  ;;  %v421_v35 = vadd.f32 %v413_v63, %v412_v3  ;;  %v422_v37 = vmax.f32 %v414_v51, 0.0 }
  0x5e   : > { %v423_v31 = vmax.f32 %v415_v43, 0.0  ;;  %v424_v52 = vmax.f32 %v416_v21, 0.0  ;;  %v425_v53 = vmax.f32 %v417_v55, 0.0  ;;  %v426_v32 = vmax.f32 %v418_v34, 0.0 }
  0x5f   : > { %v427_v54 = vmax.f32 %v419_v28, 0.0  ;;  %v428_v33 = vmax.f32 %v420_v30, 0.0  ;;  %v429_v29 = vmax.f32 %v421_v35, 0.0  ;;  %v1299_v56 = vadd.f32 %v422_v37, %v1223_v22 }
  0x60   : > { %v1302_v57 = vadd.f32 %v423_v31, %v1226_v26  ;;  %v1305_v63 = vadd.f32 %v424_v52, %v1229_v39  ;;  %v1308_v58 = vadd.f32 %v425_v53, %v1232_v23  ;;  %v1311_v61 = vadd.f32 %v426_v32, %v1235_v24 }
  0x61   : > { %v1314_v7 = vadd.f32 %v427_v54, %v1238_v27  ;;  %v1317_v16 = vadd.f32 %v428_v33, %v1241_v25  ;;  %v1320_v22 = vadd.f32 %v429_v29, %v1244_v17  ;;  %v440_v26 = vstv %s1258_s11 }
  0x62   : > { %v449_v8 = vstv %s1272_s12  ;;  %v476_v18 = vstv %s1286_s13  ;;  %v485_v39 = vstv %s1292_s14  ;;  %v441_v19 = vmul.f32 %v440_v26, %v981_v0 }
  0x63   : > { %v442_v23 = vmul.f32 %v440_v26, %v984_v1  ;;  %v443_v24 = vmul.f32 %v440_v26, %v987_v2  ;;  %v444_v62 = vmul.f32 %v440_v26, %v990_v4  ;;  %v445_v27 = vmul.f32 %v440_v26, %v993_v5 }
  0x64   : > { %v446_v25 = vmul.f32 %v440_v26, %v996_v6  ;;  %v447_v20 = vmul.f32 %v440_v26, %v1002_v11  ;;  %v448_v17 = vmul.f32 %v440_v26, %v1005_v12  ;;  %v450_v36 = vadd.f32 %v449_v8, %v441_v19 }
  0x65   : > { %v451_v44 = vadd.f32 %v449_v8, %v442_v23  ;;  %v452_v45 = vadd.f32 %v449_v8, %v443_v24  ;;  %v453_v46 = vadd.f32 %v449_v8, %v444_v62  ;;  %v454_v10 = vadd.f32 %v449_v8, %v445_v27 }
  0x66   : > { %v455_v13 = vadd.f32 %v449_v8, %v446_v25  ;;  %v456_v50 = vadd.f32 %v449_v8, %v447_v20  ;;  %v457_v14 = vadd.f32 %v449_v8, %v448_v17  ;;  %v458_v15 = vmin.f32 %v450_v36, 0.0 }
  0x67   : > { %v459_v60 = vmin.f32 %v451_v44, 0.0  ;;  %v460_v42 = vmin.f32 %v452_v45, 0.0  ;;  %v461_v3 = vmin.f32 %v453_v46, 0.0  ;;  %v462_v51 = vmin.f32 %v454_v10, 0.0 }
  0x68   : > { %v463_v43 = vmin.f32 %v455_v13, 0.0  ;;  %v464_v21 = vmin.f32 %v456_v50, 0.0  ;;  %v465_v55 = vmin.f32 %v457_v14, 0.0  ;;  %v1337_v34 = vadd.f32 %v458_v15, %v1261_v38 }
  0x69   : > { %v1340_v28 = vadd.f32 %v459_v60, %v1264_v47  ;;  %v1343_v30 = vadd.f32 %v460_v42, %v1267_v48  ;;  %v1346_v35 = vadd.f32 %v461_v3, %v1270_v40  ;;  %v1351_v37 = vadd.f32 %v462_v51, %v1275_v49 }
  0x6a   : > { %v1354_v31 = vadd.f32 %v463_v43, %v1278_v41  ;;  %v1357_v38 = vadd.f32 %v464_v21, %v1281_v59  ;;  %v1360_v47 = vadd.f32 %v465_v55, %v1284_v9  ;;  %v477_v48 = vmul.f32 %v476_v18, %v981_v0 }
  0x6b   : > { %v478_v40 = vmul.f32 %v476_v18, %v984_v1  ;;  %v479_v52 = vmul.f32 %v476_v18, %v987_v2  ;;  %v480_v49 = vmul.f32 %v476_v18, %v990_v4  ;;  %v481_v41 = vmul.f32 %v476_v18, %v993_v5 }
  0x6c   : > { %v482_v59 = vmul.f32 %v476_v18, %v996_v6  ;;  %v483_v53 = vmul.f32 %v476_v18, %v1002_v11  ;;  %v484_v9 = vmul.f32 %v476_v18, %v1005_v12  ;;  %v486_v32 = vadd.f32 %v485_v39, %v477_v48 }
  0x6d   : > { %v487_v54 = vadd.f32 %v485_v39, %v478_v40  ;;  %v488_v33 = vadd.f32 %v485_v39, %v479_v52  ;;  %v489_v29 = vadd.f32 %v485_v39, %v480_v49  ;;  %v490_v26 = vadd.f32 %v485_v39, %v481_v41 }
  0x6e   : > { %v491_v8 = vadd.f32 %v485_v39, %v482_v59  ;;  %v492_v19 = vadd.f32 %v485_v39, %v483_v53  ;;  %v493_v23 = vadd.f32 %v485_v39, %v484_v9  ;;  %v494_v24 = vmin.f32 %v486_v32, 0.0 }
  0x6f   : > { %v495_v62 = vmin.f32 %v487_v54, 0.0  ;;  %v496_v27 = vmin.f32 %v488_v33, 0.0  ;;  %v497_v25 = vmin.f32 %v489_v29, 0.0  ;;  %v498_v20 = vmin.f32 %v490_v26, 0.0 }
  0x70   : > { %v499_v17 = vmin.f32 %v491_v8, 0.0  ;;  %v500_v36 = vmin.f32 %v492_v19, 0.0  ;;  %v501_v18 = vmin.f32 %v493_v23, 0.0  ;;  %v1375_v44 = vadd.f32 %v494_v24, %v1299_v56 }
  0x71   : > { %v1378_v45 = vadd.f32 %v495_v62, %v1302_v57  ;;  %v1381_v39 = vadd.f32 %v496_v27, %v1305_v63  ;;  %v1384_v46 = vadd.f32 %v497_v25, %v1308_v58  ;;  %v1387_v10 = vadd.f32 %v498_v20, %v1311_v61 }
  0x72   : > { %v1390_v13 = vadd.f32 %v499_v17, %v1314_v7  ;;  %v1393_v50 = vadd.f32 %v500_v36, %v1317_v16  ;;  %v1396_v56 = vadd.f32 %v501_v18, %v1320_v22  ;;  %v512_v57 = vstv %s1334_s15 }
  0x73   : > { %v521_v14 = vstv %s1348_s16  ;;  %v548_v15 = vstv %s1362_s17  ;;  %v557_v63 = vstv %s1368_s18  ;;  %v513_v60 = vmul.f32 %v512_v57, %v981_v0 }
  0x74   : > { %v514_v58 = vmul.f32 %v512_v57, %v984_v1  ;;  %v515_v61 = vmul.f32 %v512_v57, %v987_v2  ;;  %v516_v42 = vmul.f32 %v512_v57, %v990_v4  ;;  %v517_v7 = vmul.f32 %v512_v57, %v993_v5 }
  0x75   : > { %v518_v16 = vmul.f32 %v512_v57, %v996_v6  ;;  %v519_v3 = vmul.f32 %v512_v57, %v1002_v11  ;;  %v520_v22 = vmul.f32 %v512_v57, %v1005_v12  ;;  %v522_v51 = vadd.f32 %v521_v14, %v513_v60 }
  0x76   : > { %v523_v43 = vadd.f32 %v521_v14, %v514_v58  ;;  %v524_v21 = vadd.f32 %v521_v14, %v515_v61  ;;  %v525_v55 = vadd.f32 %v521_v14, %v516_v42  ;;  %v526_v48 = vadd.f32 %v521_v14, %v517_v7 }
  0x77   : > { %v527_v40 = vadd.f32 %v521_v14, %v518_v16  ;;  %v528_v52 = vadd.f32 %v521_v14, %v519_v3  ;;  %v529_v49 = vadd.f32 %v521_v14, %v520_v22  ;;  %v530_v41 = vmax.f32 %v522_v51, 0.0 }
  0x78   : > { %v531_v59 = vmax.f32 %v523_v43, 0.0  ;;  %v532_v53 = vmax.f32 %v524_v21, 0.0  ;;  %v533_v9 = vmax.f32 %v525_v55, 0.0  ;;  %v534_v32 = vmax.f32 %v526_v48, 0.0 }
  0x79   : > { %v535_v54 = vmax.f32 %v527_v40, 0.0  ;;  %v536_v33 = vmax.f32 %v528_v52, 0.0  ;;  %v537_v29 = vmax.f32 %v529_v49, 0.0  ;;  %v1413_v26 = vadd.f32 %v530_v41, %v1337_v34 }
  0x7a   : > { %v1416_v8 = vadd.f32 %v531_v59, %v1340_v28  ;;  %v1419_v19 = vadd.f32 %v532_v53, %v1343_v30  ;;  %v1422_v23 = vadd.f32 %v533_v9, %v1346_v35  ;;  %v1427_v24 = vadd.f32 %v534_v32, %v1351_v37 }
  0x7b   : > { %v1430_v62 = vadd.f32 %v535_v54, %v1354_v31  ;;  %v1433_v34 = vadd.f32 %v536_v33, %v1357_v38  ;;  %v1436_v28 = vadd.f32 %v537_v29, %v1360_v47  ;;  %v549_v30 = vmul.f32 %v548_v15, %v981_v0 }
  0x7c   : > { %v550_v35 = vmul.f32 %v548_v15, %v984_v1  ;;  %v551_v27 = vmul.f32 %v548_v15, %v987_v2  ;;  %v552_v37 = vmul.f32 %v548_v15, %v990_v4  ;;  %v553_v31 = vmul.f32 %v548_v15, %v993_v5 }
  0x7d   : > { %v554_v38 = vmul.f32 %v548_v15, %v996_v6  ;;  %v555_v25 = vmul.f32 %v548_v15, %v1002_v11  ;;  %v556_v47 = vmul.f32 %v548_v15, %v1005_v12  ;;  %v558_v20 = vadd.f32 %v557_v63, %v549_v30 }
  0x7e   : > { %v559_v17 = vadd.f32 %v557_v63, %v550_v35  ;;  %v560_v36 = vadd.f32 %v557_v63, %v551_v27  ;;  %v561_v18 = vadd.f32 %v557_v63, %v552_v37  ;;  %v562_v57 = vadd.f32 %v557_v63, %v553_v31 }
  0x7f   : > { %v563_v14 = vadd.f32 %v557_v63, %v554_v38  ;;  %v564_v60 = vadd.f32 %v557_v63, %v555_v25  ;;  %v565_v58 = vadd.f32 %v557_v63, %v556_v47  ;;  %v566_v61 = vmax.f32 %v558_v20, 0.0 }
  0x80   : > { %v567_v42 = vmax.f32 %v559_v17, 0.0  ;;  %v568_v7 = vmax.f32 %v560_v36, 0.0  ;;  %v569_v16 = vmax.f32 %v561_v18, 0.0  ;;  %v570_v3 = vmax.f32 %v562_v57, 0.0 }
  0x81   : > { %v571_v22 = vmax.f32 %v563_v14, 0.0  ;;  %v572_v51 = vmax.f32 %v564_v60, 0.0  ;;  %v573_v15 = vmax.f32 %v565_v58, 0.0  ;;  %v1451_v43 = vadd.f32 %v566_v61, %v1375_v44 }
  0x82   : > { %v1454_v21 = vadd.f32 %v567_v42, %v1378_v45  ;;  %v1457_v63 = vadd.f32 %v568_v7, %v1381_v39  ;;  %v1460_v55 = vadd.f32 %v569_v16, %v1384_v46  ;;  %v1463_v48 = vadd.f32 %v570_v3, %v1387_v10 }
  0x83   : > { %v1466_v40 = vadd.f32 %v571_v22, %v1390_v13  ;;  %v1469_v52 = vadd.f32 %v572_v51, %v1393_v50  ;;  %v1472_v44 = vadd.f32 %v573_v15, %v1396_v56  ;;  %v584_v45 = vstv %s1410_s20 }
  0x84   : > { %v593_v49 = vstv %s1424_s21  ;;  %v620_v41 = vstv %s1438_s22  ;;  %v629_v39 = vstv %s1444_s24  ;;  %v585_v59 = vmul.f32 %v584_v45, %v981_v0 }
  0x85   : > { %v586_v46 = vmul.f32 %v584_v45, %v984_v1  ;;  %v587_v10 = vmul.f32 %v584_v45, %v987_v2  ;;  %v588_v53 = vmul.f32 %v584_v45, %v990_v4  ;;  %v589_v13 = vmul.f32 %v584_v45, %v993_v5 }
  0x86   : > { %v590_v50 = vmul.f32 %v584_v45, %v996_v6  ;;  %v591_v9 = vmul.f32 %v584_v45, %v1002_v11  ;;  %v592_v56 = vmul.f32 %v584_v45, %v1005_v12  ;;  %v594_v32 = vadd.f32 %v593_v49, %v585_v59 }
  0x87   : > { %v595_v54 = vadd.f32 %v593_v49, %v586_v46  ;;  %v596_v33 = vadd.f32 %v593_v49, %v587_v10  ;;  %v597_v29 = vadd.f32 %v593_v49, %v588_v53  ;;  %v598_v30 = vadd.f32 %v593_v49, %v589_v13 }
  0x88   : > { %v599_v35 = vadd.f32 %v593_v49, %v590_v50  ;;  %v600_v27 = vadd.f32 %v593_v49, %v591_v9  ;;  %v601_v37 = vadd.f32 %v593_v49, %v592_v56  ;;  %v602_v31 = vmax.f32 %v594_v32, 0.0 }
  0x89   : > { %v603_v38 = vmax.f32 %v595_v54, 0.0  ;;  %v604_v25 = vmax.f32 %v596_v33, 0.0  ;;  %v605_v47 = vmax.f32 %v597_v29, 0.0  ;;  %v606_v20 = vmax.f32 %v598_v30, 0.0 }
  0x8a   : > { %v607_v17 = vmax.f32 %v599_v35, 0.0  ;;  %v608_v36 = vmax.f32 %v600_v27, 0.0  ;;  %v609_v18 = vmax.f32 %v601_v37, 0.0  ;;  %v1489_v57 = vadd.f32 %v602_v31, %v1413_v26 }
  0x8b   : > { %v1492_v14 = vadd.f32 %v603_v38, %v1416_v8  ;;  %v1495_v60 = vadd.f32 %v604_v25, %v1419_v19  ;;  %v1498_v58 = vadd.f32 %v605_v47, %v1422_v23  ;;  %v1503_v61 = vadd.f32 %v606_v20, %v1427_v24 }
  0x8c   : > { %v1506_v42 = vadd.f32 %v607_v17, %v1430_v62  ;;  %v1509_v26 = vadd.f32 %v608_v36, %v1433_v34  ;;  %v1512_v8 = vadd.f32 %v609_v18, %v1436_v28  ;;  %v621_v19 = vmul.f32 %v620_v41, %v981_v0 }
  0x8d   : > { %v622_v23 = vmul.f32 %v620_v41, %v984_v1  ;;  %v623_v7 = vmul.f32 %v620_v41, %v987_v2  ;;  %v624_v24 = vmul.f32 %v620_v41, %v990_v4  ;;  %v625_v62 = vmul.f32 %v620_v41, %v993_v5 }
  0x8e   : > { %v626_v34 = vmul.f32 %v620_v41, %v996_v6  ;;  %v627_v16 = vmul.f32 %v620_v41, %v1002_v11  ;;  %v628_v28 = vmul.f32 %v620_v41, %v1005_v12  ;;  %v630_v3 = vadd.f32 %v629_v39, %v621_v19 }
  0x8f   : > { %v631_v22 = vadd.f32 %v629_v39, %v622_v23  ;;  %v632_v51 = vadd.f32 %v629_v39, %v623_v7  ;;  %v633_v15 = vadd.f32 %v629_v39, %v624_v24  ;;  %v634_v45 = vadd.f32 %v629_v39, %v625_v62 }
  0x90   : > { %v635_v49 = vadd.f32 %v629_v39, %v626_v34  ;;  %v636_v59 = vadd.f32 %v629_v39, %v627_v16  ;;  %v637_v46 = vadd.f32 %v629_v39, %v628_v28  ;;  %v638_v10 = vmax.f32 %v630_v3, 0.0 }
  0x91   : > { %v639_v53 = vmax.f32 %v631_v22, 0.0  ;;  %v640_v13 = vmax.f32 %v632_v51, 0.0  ;;  %v641_v50 = vmax.f32 %v633_v15, 0.0  ;;  %v642_v9 = vmax.f32 %v634_v45, 0.0  ;;  %v893_v45 = vld [vmem:[%s976_s23] sm:$0xff] }
  0x92   : > { %v643_v56 = vmax.f32 %v635_v49, 0.0  ;;  %v644_v32 = vmax.f32 %v636_v59, 0.0  ;;  %v645_v41 = vmax.f32 %v637_v46, 0.0  ;;  %v1527_v54 = vadd.f32 %v638_v10, %v1451_v43  ;;  %v894_v49 = vld [vmem:[%s976_s23 + $0x8] sm:$0xff] }
  0x93   : > { %v1530_v33 = vadd.f32 %v639_v53, %v1454_v21  ;;  %v1533_v39 = vadd.f32 %v640_v13, %v1457_v63  ;;  %v1536_v29 = vadd.f32 %v641_v50, %v1460_v55  ;;  %v1539_v30 = vadd.f32 %v642_v9, %v1463_v48  ;;  %v897_v53 = vld [vmem:[%s976_s23 + $0x20] sm:$0xff]  ;;  %v898_v13 = vld [vmem:[%s976_s23 + $0x28] sm:$0xff]  ;;  %v899_v50 = vld [vmem:[%s976_s23 + $0x30] sm:$0xff] }
  0x94   : > { %v1542_v35 = vadd.f32 %v643_v56, %v1466_v40  ;;  %v1545_v27 = vadd.f32 %v644_v32, %v1469_v52  ;;  %v1548_v43 = vadd.f32 %v645_v41, %v1472_v44  ;;  %v656_v21 = vstv %s1486_s25 }
  0x95   : > { %v665_v37 = vstv %s1500_s26  ;;  %v692_v31 = vstv %s1514_s27  ;;  %v701_v63 = vstv %s1520_s28  ;;  %v657_v38 = vmul.f32 %v656_v21, %v981_v0 }
  0x96   : > { %v658_v55 = vmul.f32 %v656_v21, %v984_v1  ;;  %v659_v48 = vmul.f32 %v656_v21, %v987_v2  ;;  %v660_v25 = vmul.f32 %v656_v21, %v990_v4  ;;  %v661_v40 = vmul.f32 %v656_v21, %v993_v5 }
  0x97   : > { %v662_v52 = vmul.f32 %v656_v21, %v996_v6  ;;  %v663_v47 = vmul.f32 %v656_v21, %v1002_v11  ;;  %v664_v44 = vmul.f32 %v656_v21, %v1005_v12  ;;  %v666_v20 = vadd.f32 %v665_v37, %v657_v38 }
  0x98   : > { %v667_v17 = vadd.f32 %v665_v37, %v658_v55  ;;  %v668_v36 = vadd.f32 %v665_v37, %v659_v48  ;;  %v669_v18 = vadd.f32 %v665_v37, %v660_v25  ;;  %v670_v19 = vadd.f32 %v665_v37, %v661_v40 }
  0x99   : > { %v671_v0 = vadd.f32 %v665_v37, %v662_v52  ;;  %v672_v23 = vadd.f32 %v665_v37, %v663_v47  ;;  %v673_v1 = vadd.f32 %v665_v37, %v664_v44  ;;  %v674_v7 = vmin.f32 %v666_v20, 0.0 }
  0x9a   : > { %v675_v2 = vmin.f32 %v667_v17, 0.0  ;;  %v676_v4 = vmin.f32 %v668_v36, 0.0  ;;  %v677_v5 = vmin.f32 %v669_v18, 0.0  ;;  %v678_v24 = vmin.f32 %v670_v19, 0.0 }
  0x9b   : > { %v679_v6 = vmin.f32 %v671_v0, 0.0  ;;  %v680_v11 = vmin.f32 %v672_v23, 0.0  ;;  %v681_v12 = vmin.f32 %v673_v1, 0.0  ;;  %v682_v62 = vadd.f32 %v674_v7, %v1489_v57 }
  0x9c   : > { %v683_v34 = vadd.f32 %v675_v2, %v1492_v14  ;;  %v684_v16 = vadd.f32 %v676_v4, %v1495_v60  ;;  %v685_v28 = vadd.f32 %v677_v5, %v1498_v58  ;;  %v686_v3 = vadd.f32 %v678_v24, %v1503_v61  ;;  %v895_v14 = vld [vmem:[%s976_s23 + $0x10] sm:$0xff]  ;;  %v896_v60 = vld [vmem:[%s976_s23 + $0x18] sm:$0xff] }
  0x9d   : > { %v687_v22 = vadd.f32 %v679_v6, %v1506_v42  ;;  %v688_v51 = vadd.f32 %v680_v11, %v1509_v26  ;;  %v689_v15 = vadd.f32 %v681_v12, %v1512_v8  ;;  %v693_v57 = vmul.f32 %v893_v45, %v692_v31  ;;  %v900_v42 = vld [vmem:[%s976_s23 + $0x38] sm:$0xff] }
  0x9e   : > { %v694_v59 = vmul.f32 %v894_v49, %v692_v31  ;;  %v695_v46 = vmul.f32 %v895_v14, %v692_v31  ;;  %v696_v10 = vmul.f32 %v896_v60, %v692_v31  ;;  %v697_v58 = vmul.f32 %v897_v53, %v692_v31 }
  0x9f   : > { %v698_v61 = vmul.f32 %v898_v13, %v692_v31  ;;  %v699_v9 = vmul.f32 %v899_v50, %v692_v31  ;;  %v700_v56 = vmul.f32 %v900_v42, %v692_v31  ;;  %v702_v26 = vadd.f32 %v701_v63, %v693_v57 }
  0xa0   : > { %v703_v32 = vadd.f32 %v701_v63, %v694_v59  ;;  %v704_v41 = vadd.f32 %v701_v63, %v695_v46  ;;  %v705_v8 = vadd.f32 %v701_v63, %v696_v10  ;;  %v706_v21 = vadd.f32 %v701_v63, %v697_v58 }
  0xa1   : > { %v707_v37 = vadd.f32 %v701_v63, %v698_v61  ;;  %v708_v38 = vadd.f32 %v701_v63, %v699_v9  ;;  %v709_v55 = vadd.f32 %v701_v63, %v700_v56  ;;  %v710_v48 = vmax.f32 %v702_v26, 0.0 }
  0xa2   : > { %v711_v25 = vmax.f32 %v703_v32, 0.0  ;;  %v712_v40 = vmax.f32 %v704_v41, 0.0  ;;  %v713_v52 = vmax.f32 %v705_v8, 0.0  ;;  %v714_v47 = vmax.f32 %v706_v21, 0.0 }
  0xa3   : > { %v715_v44 = vmax.f32 %v707_v37, 0.0  ;;  %v716_v20 = vmax.f32 %v708_v38, 0.0  ;;  %v717_v17 = vmax.f32 %v709_v55, 0.0  ;;  %v718_v36 = vadd.f32 %v710_v48, %v1527_v54 }
  0xa4   : > { %v719_v31 = vadd.f32 %v711_v25, %v1530_v33  ;;  %v720_v18 = vadd.f32 %v712_v40, %v1533_v39  ;;  %v721_v19 = vadd.f32 %v713_v52, %v1536_v29  ;;  %v722_v0 = vadd.f32 %v714_v47, %v1539_v30 }
  0xa5   : > { %v723_v63 = vadd.f32 %v715_v44, %v1542_v35  ;;  %v724_v23 = vadd.f32 %v716_v20, %v1545_v27  ;;  %v725_v1 = vadd.f32 %v717_v17, %v1548_v43  ;;  %v726_v7 = vadd.f32 %v718_v36, %v682_v62 }
  0xa6   : > { %v727_v2 = vadd.f32 %v719_v31, %v683_v34  ;;  %v728_v4 = vadd.f32 %v720_v18, %v684_v16  ;;  %v729_v5 = vadd.f32 %v721_v19, %v685_v28  ;;  %v730_v54 = vadd.f32 %v722_v0, %v686_v3 }
  0xa7   : > { %v731_v24 = vadd.f32 %v723_v63, %v687_v22  ;;  %v732_v33 = vadd.f32 %v724_v23, %v688_v51  ;;  %v733_v6 = vadd.f32 %v725_v1, %v689_v15  ;;  %v735_v39 = vstv %s869_s29 }
  0xa8   : > { %v736_v11 = vadd.f32 %v893_v45, %v735_v39  ;;  %v737_v29 = vadd.f32 %v894_v49, %v735_v39  ;;  %v738_v12 = vadd.f32 %v895_v14, %v735_v39  ;;  %v739_v30 = vadd.f32 %v896_v60, %v735_v39 }
  0xa9   : > { %v740_v35 = vadd.f32 %v897_v53, %v735_v39  ;;  %v741_v27 = vadd.f32 %v898_v13, %v735_v39  ;;  %v742_v43 = vadd.f32 %v899_v50, %v735_v39  ;;  %v743_v62 = vadd.f32 %v900_v42, %v735_v39 }
  0xaa   : > { %v744_v34 = vadd.f32 %v736_v11, %v726_v7  ;;  %v745_v16 = vadd.f32 %v737_v29, %v727_v2  ;;  %v746_v28 = vadd.f32 %v738_v12, %v728_v4  ;;  %v747_v3 = vadd.f32 %v739_v30, %v729_v5 }
  0xab   : > { %v748_v22 = vadd.f32 %v740_v35, %v730_v54  ;;  %v749_v51 = vadd.f32 %v741_v27, %v731_v24  ;;  %v750_v15 = vadd.f32 %v742_v43, %v732_v33  ;;  %v751_v45 = vadd.f32 %v743_v62, %v733_v6 }
  0xac   : > { %752 = vst [vmem:[%s157_s3] sm:$0xff] %v744_v34  ;;  %753 = vst [vmem:[%s157_s3 + $0x8] sm:$0xff] %v745_v16 }
  0xad   : > { %754 = vst [vmem:[%s157_s3 + $0x10] sm:$0xff] %v746_v28  ;;  %755 = vst [vmem:[%s157_s3 + $0x18] sm:$0xff] %v747_v3 }
  0xae   : > { %756 = vst [vmem:[%s157_s3 + $0x20] sm:$0xff] %v748_v22  ;;  %757 = vst [vmem:[%s157_s3 + $0x28] sm:$0xff] %v749_v51 }
  0xaf   : > { %758 = vst [vmem:[%s157_s3 + $0x30] sm:$0xff] %v750_v15  ;;  %759 = vst [vmem:[%s157_s3 + $0x38] sm:$0xff] %v751_v45 }
  0xb0 PF: > { %s13_s9 = sadd.s32 1, %s926_s9  }
  0xb1   : > { %p10_p1 = scmp.ge.s32.totalorder %s13_s9, 10  }
  0xb3   :  { %12 = sbr.rel (!%p10_p1) target bundleno = 1 (0x1), region = 63 }
  0xb8   :  { %781 = vsyncpa [#allocation3], 1 }
  0xb9   :  { %783 = vsyncpa [#allocation3 + $0x1], 1 }

</bundles_post_ra>
